<compile_context>
chip_gen: v5e
topology: v5e:2x2
jax: 0.10.0
libtpu: 0.0.40
codegen_flags: <defaults>
</compile_context>

<pallas_src>
import functools

import jax
import jax.numpy as jnp
from jax.experimental import pallas as pl
from jax.experimental.pallas import tpu as pltpu


def _dice_partial_kernel(x_ref, t_ref, i_ref, d_ref, *,
                         m_total, tm, kt, needs_mask):
    # x_ref, t_ref: (R, tm) VMEM tiles; i_ref, d_ref: (R, 1) resident accumulators
    s = pl.program_id(0)   # parallel split over the spatial axis
    k = pl.program_id(1)   # sequential reduction within the split

    @pl.when(k == 0)
    def _():
        i_ref[...] = jnp.zeros_like(i_ref)
        d_ref[...] = jnp.zeros_like(d_ref)

    x = x_ref[...].astype(jnp.float32)
    t = t_ref[...].astype(jnp.float32)
    p = jax.nn.sigmoid(x)                        # EUP-backed logistic

    if needs_mask:
        # mask tail lanes past the true spatial extent (padding is NOT benign:
        # sigmoid(0) = 0.5 would pollute the denominator)
        col = jax.lax.broadcasted_iota(jnp.int32, x.shape, 1) + (s * kt + k) * tm
        valid = col < m_total
        p = jnp.where(valid, p, 0.0)
        t = jnp.where(valid, t, 0.0)

    i_ref[...] += jnp.sum(p * t, axis=-1, keepdims=True)
    d_ref[...] += jnp.sum(p + t, axis=-1, keepdims=True)


def dice_loss(inp, target, *, epsilon=1e-5):
    """Matches DiceLoss(sigmoid_normalization=True, weight=None,
    ignore_index=None, skip_last_target=False).forward(inp, target)."""
    assert inp.shape == target.shape, "'input' and 'target' must have the same shape"
    N, C = inp.shape[0], inp.shape[1]
    R = N * C

    # Contiguous (free) reshape — no HBM transpose.
    x2d = inp.reshape(R, -1)
    t2d = target.reshape(R, -1)
    M = x2d.shape[1]

    # Tile sizing: ~4 MiB f32 per input block (safe for v7x's 64 MiB VMEM,
    # comfortably roofline-friendly on v5e/v6e), lane-multiple of 128.
    budget_elems = (4 * 1024 * 1024) // 4
    tm = max(128, (budget_elems // max(R, 1)) // 128 * 128)
    m_pad128 = pl.cdiv(M, 128) * 128
    tm = min(tm, m_pad128)

    n_tiles = pl.cdiv(m_pad128, tm)
    S = 2 if n_tiles >= 2 else 1          # leading parallel split (v7x megacore)
    KT = pl.cdiv(n_tiles, S)
    m_pad = S * KT * tm
    needs_mask = (m_pad != M)
    if m_pad != M:
        pad = m_pad - M
        x2d = jnp.pad(x2d, ((0, 0), (0, pad)))
        t2d = jnp.pad(t2d, ((0, 0), (0, pad)))

    kernel = functools.partial(
        _dice_partial_kernel, m_total=M, tm=tm, kt=KT, needs_mask=needs_mask)

    i_part, d_part = pl.pallas_call(
        kernel,
        out_shape=(jax.ShapeDtypeStruct((S, R, 1), jnp.float32),
                   jax.ShapeDtypeStruct((S, R, 1), jnp.float32)),
        grid=(S, KT),
        in_specs=[
            pl.BlockSpec((R, tm), lambda s, k: (0, s * KT + k)),
            pl.BlockSpec((R, tm), lambda s, k: (0, s * KT + k)),
        ],
        out_specs=(
            pl.BlockSpec((None, R, 1), lambda s, k: (s, 0, 0)),
            pl.BlockSpec((None, R, 1), lambda s, k: (s, 0, 0)),
        ),
        compiler_params=pltpu.CompilerParams(
            dimension_semantics=("parallel", "arbitrary"),
            vmem_limit_bytes=32 * 1024 * 1024),
    )(x2d, t2d)

    # Fold split partials, then the N rows per channel (tiny: N*C scalars).
    intersect = i_part.sum(axis=0)[:, 0].reshape(N, C).sum(axis=0)   # (C,)
    denom = d_part.sum(axis=0)[:, 0].reshape(N, C).sum(axis=0)       # (C,)
    dice = 2.0 * intersect / jnp.maximum(denom, epsilon)
    return jnp.mean(1.0 - dice)


def _dice_loss_ref(inp, target, epsilon=1e-5):
    # Pure-JAX reference mirroring the PyTorch code.
    C = inp.shape[1]
    perm = (1, 0) + tuple(range(2, inp.ndim))
    p = jax.nn.sigmoid(inp)
    pf = jnp.transpose(p, perm).reshape(C, -1).astype(jnp.float32)
    tf = jnp.transpose(target, perm).reshape(C, -1).astype(jnp.float32)
    intersect = jnp.sum(pf * tf, axis=-1)
    denom = jnp.sum(pf + tf, axis=-1)
    dice = 2.0 * intersect / jnp.maximum(denom, epsilon)
    return jnp.mean(1.0 - dice)


if __name__ == "__main__":
    key = jax.random.PRNGKey(0)
    k1, k2 = jax.random.split(key)
    # Small NCHW shapes consistent with the module's forward.
    N, C, H, W = 2, 4, 16, 16
    x = jax.random.normal(k1, (N, C, H, W), dtype=jnp.float32)
    target = (jax.random.uniform(k2, (N, C, H, W)) > 0.5).astype(jnp.float32)

    loss = jax.block_until_ready(dice_loss(x, target))
    ref = jax.block_until_ready(_dice_loss_ref(x, target))

    assert jnp.allclose(loss, ref, atol=1e-5, rtol=1e-5), (loss, ref)
    print("KERNEL_OK")
</pallas_src>

<mosaic_0001>
module attributes {stable_mosaic.version = 11 : i64} {
  func.func @_dice_partial_kernel(%arg0: i32, %arg1: i32, %arg2: memref<8x256xf32, #tpu.memory_space<vmem>>, %arg3: memref<8x256xf32, #tpu.memory_space<vmem>>, %arg4: memref<1x8x1xf32, #tpu.memory_space<vmem>>, %arg5: memref<1x8x1xf32, #tpu.memory_space<vmem>>) attributes {dimension_semantics = [#tpu.dimension_semantics<parallel>, #tpu.dimension_semantics<arbitrary>], iteration_bounds = array<i64: 1, 1>, scalar_prefetch = 0 : i64, scratch_operands = 0 : i64, tpu.core_type = #tpu.core_type<tc>, window_params = [{transform_indices = @transform_0, window_bounds = array<i64: 8, 256>}, {transform_indices = @transform_1, window_bounds = array<i64: 8, 256>}, {transform_indices = @transform_2, window_bounds = array<i64: 1, 8, 1>}, {transform_indices = @transform_3, window_bounds = array<i64: 1, 8, 1>}]} {
    %c0_i32 = arith.constant 0 : i32
    %0 = arith.cmpi eq, %arg1, %c0_i32 : i32
    %1 = arith.extui %0 : i1 to i32
    %c0_i32_0 = arith.constant 0 : i32
    %2 = arith.cmpi ne, %1, %c0_i32_0 : i32
    scf.if %2 {
      %cst_18 = arith.constant 0.000000e+00 : f32
      %28 = vector.broadcast %cst_18 : f32 to vector<8x1xf32>
      %c0_19 = arith.constant 0 : index
      %c0_20 = arith.constant 0 : index
      %c0_21 = arith.constant 0 : index
      %29 = vector.load %arg4[%c0_19, %c0_20, %c0_21] : memref<1x8x1xf32, #tpu.memory_space<vmem>>, vector<1x8x1xf32>
      %30 = vector.shape_cast %29 : vector<1x8x1xf32> to vector<8x1xf32>
      %31 = vector.shape_cast %28 : vector<8x1xf32> to vector<1x8x1xf32>
      tpu.vector_store %arg4[%c0_19, %c0_20, %c0_21], %31 {strides = array<i32>} : memref<1x8x1xf32, #tpu.memory_space<vmem>>, vector<1x8x1xf32>,
      %cst_22 = arith.constant 0.000000e+00 : f32
      %32 = vector.broadcast %cst_22 : f32 to vector<8x1xf32>
      %c0_23 = arith.constant 0 : index
      %c0_24 = arith.constant 0 : index
      %c0_25 = arith.constant 0 : index
      %33 = vector.load %arg5[%c0_23, %c0_24, %c0_25] : memref<1x8x1xf32, #tpu.memory_space<vmem>>, vector<1x8x1xf32>
      %34 = vector.shape_cast %33 : vector<1x8x1xf32> to vector<8x1xf32>
      %35 = vector.shape_cast %32 : vector<8x1xf32> to vector<1x8x1xf32>
      tpu.vector_store %arg5[%c0_23, %c0_24, %c0_25], %35 {strides = array<i32>} : memref<1x8x1xf32, #tpu.memory_space<vmem>>, vector<1x8x1xf32>,
    } else {
    }
    %c0 = arith.constant 0 : index
    %c0_1 = arith.constant 0 : index
    %3 = vector.load %arg2[%c0, %c0_1] : memref<8x256xf32, #tpu.memory_space<vmem>>, vector<8x256xf32>
    %c0_2 = arith.constant 0 : index
    %c0_3 = arith.constant 0 : index
    %4 = vector.load %arg3[%c0_2, %c0_3] : memref<8x256xf32, #tpu.memory_space<vmem>>, vector<8x256xf32>
    %5 = arith.negf %3 : vector<8x256xf32>
    %6 = math.exp %5 : vector<8x256xf32>
    %cst = arith.constant 1.000000e+00 : f32
    %7 = vector.broadcast %cst : f32 to vector<8x256xf32>
    %8 = arith.addf %7, %6 : vector<8x256xf32>
    %9 = arith.divf %7, %8 : vector<8x256xf32>
    %c0_4 = arith.constant 0 : index
    %c0_5 = arith.constant 0 : index
    %c0_6 = arith.constant 0 : index
    %10 = vector.load %arg4[%c0_4, %c0_5, %c0_6] : memref<1x8x1xf32, #tpu.memory_space<vmem>>, vector<1x8x1xf32>
    %11 = vector.shape_cast %10 : vector<1x8x1xf32> to vector<8x1xf32>
    %12 = arith.mulf %9, %4 : vector<8x256xf32>
    %cst_7 = arith.constant dense<0.000000e+00> : vector<8xf32>
    %13 = vector.multi_reduction <add>, %12, %cst_7 [1] : vector<8x256xf32> to vector<8xf32>
    %14 = vector.shape_cast %13 : vector<8xf32> to vector<8x1xf32>
    %15 = arith.addf %11, %14 : vector<8x1xf32>
    %c0_8 = arith.constant 0 : index
    %c0_9 = arith.constant 0 : index
    %c0_10 = arith.constant 0 : index
    %16 = vector.load %arg4[%c0_8, %c0_9, %c0_10] : memref<1x8x1xf32, #tpu.memory_space<vmem>>, vector<1x8x1xf32>
    %17 = vector.shape_cast %16 : vector<1x8x1xf32> to vector<8x1xf32>
    %18 = vector.shape_cast %15 : vector<8x1xf32> to vector<1x8x1xf32>
    tpu.vector_store %arg4[%c0_8, %c0_9, %c0_10], %18 {strides = array<i32>} : memref<1x8x1xf32, #tpu.memory_space<vmem>>, vector<1x8x1xf32>,
    %c0_11 = arith.constant 0 : index
    %c0_12 = arith.constant 0 : index
    %c0_13 = arith.constant 0 : index
    %19 = vector.load %arg5[%c0_11, %c0_12, %c0_13] : memref<1x8x1xf32, #tpu.memory_space<vmem>>, vector<1x8x1xf32>
    %20 = vector.shape_cast %19 : vector<1x8x1xf32> to vector<8x1xf32>
    %21 = arith.addf %9, %4 : vector<8x256xf32>
    %cst_14 = arith.constant dense<0.000000e+00> : vector<8xf32>
    %22 = vector.multi_reduction <add>, %21, %cst_14 [1] : vector<8x256xf32> to vector<8xf32>
    %23 = vector.shape_cast %22 : vector<8xf32> to vector<8x1xf32>
    %24 = arith.addf %20, %23 : vector<8x1xf32>
    %c0_15 = arith.constant 0 : index
    %c0_16 = arith.constant 0 : index
    %c0_17 = arith.constant 0 : index
    %25 = vector.load %arg5[%c0_15, %c0_16, %c0_17] : memref<1x8x1xf32, #tpu.memory_space<vmem>>, vector<1x8x1xf32>
    %26 = vector.shape_cast %25 : vector<1x8x1xf32> to vector<8x1xf32>
    %27 = vector.shape_cast %24 : vector<8x1xf32> to vector<1x8x1xf32>
    tpu.vector_store %arg5[%c0_15, %c0_16, %c0_17], %27 {strides = array<i32>} : memref<1x8x1xf32, #tpu.memory_space<vmem>>, vector<1x8x1xf32>,
    return
  }
  func.func @transform_0(%arg0: i32, %arg1: i32) -> (i32, i32) {
    %c1_i32 = arith.constant 1 : i32
    %0 = arith.muli %arg0, %c1_i32 : i32
    %1 = arith.addi %0, %arg1 : i32
    %c0_i32 = arith.constant 0 : i32
    %c0_i32_0 = arith.constant 0 : i32
    return %c0_i32, %1 : i32, i32
  }
  func.func @transform_1(%arg0: i32, %arg1: i32) -> (i32, i32) {
    %c1_i32 = arith.constant 1 : i32
    %0 = arith.muli %arg0, %c1_i32 : i32
    %1 = arith.addi %0, %arg1 : i32
    %c0_i32 = arith.constant 0 : i32
    %c0_i32_0 = arith.constant 0 : i32
    return %c0_i32, %1 : i32, i32
  }
  func.func @transform_2(%arg0: i32, %arg1: i32) -> (i32, i32, i32) {
    %c0_i32 = arith.constant 0 : i32
    %c0_i32_0 = arith.constant 0 : i32
    %c0_i32_1 = arith.constant 0 : i32
    return %arg0, %c0_i32, %c0_i32_0 : i32, i32, i32
  }
  func.func @transform_3(%arg0: i32, %arg1: i32) -> (i32, i32, i32) {
    %c0_i32 = arith.constant 0 : i32
    %c0_i32_0 = arith.constant 0 : i32
    %c0_i32_1 = arith.constant 0 : i32
    return %arg0, %c0_i32, %c0_i32_0 : i32, i32, i32
  }
}

</mosaic_0001>

<bundles_post_ra>
// kernel: tpu_custom_call.1
= control target key start
LH: loop header
LB: loop body
LE: loop exit
PB: predicated region body
PF: predicated region fallthrough
CT: control target
= control target key end

     0   :  { %9 = vsyncpa [#allocation3], 0  ;;  %s245_s0 = inlined_call_operand.hbm [shape: f32[8,256], index: 0, kind: input, shape index: {}]   ;;  %s246_s1 = inlined_call_operand.hbm [shape: f32[8,256], index: 1, kind: input, shape index: {}]   ;;  %s247_s2 = inlined_call_operand.vmem [shape: f32[1,8,1], index: 2, kind: output, shape index: {0}]   ;;  %s248_s3 = inlined_call_operand.vmem [shape: f32[1,8,1], index: 3, kind: output, shape index: {1}]  }
   0x1   :  { %s20_s14 = sshll.u32 %s245_s0, 4  ;;  %s21_s14 = int_to_ptr.hbm [resolvable:$true] %s20_s14 }
   0x2   :  { %10 = vsyncpa [#allocation5], 0  ;;  %s194_s15 = smov [#allocation2]   ;;  %s35_s19 = sshll.u32 %s246_s1, 4  ;;  %s36_s19 = int_to_ptr.hbm [resolvable:$true] %s35_s19 }
   0x3   :  { %s22_s16 = sshll.u32 %s194_s15, 4  ;;  %s195_s20 = smov [#allocation4]   ;;  %s23_s16 = int_to_ptr.vmem [resolvable:$true] %s22_s16 }
   0x4   :  { %25 = dma.hbm_to_vmem [thread:$0]  %s21_s14, 256, %s23_s16, [#allocation3]  }
   0x5   :  { %s37_s21 = sshll.u32 %s195_s20, 4  ;;  %s38_s21 = int_to_ptr.vmem [resolvable:$true] %s37_s21 }
   0x6   :  { %40 = dma.hbm_to_vmem [thread:$0]  %s36_s19, 256, %s38_s21, [#allocation5]  }
   0x7   :  { %190 = dma.done.wait [#allocation3], 256  }
   0x8   :  { %191 = vsyncadd [#allocation3], 4294967040 }
   0x9   :  { %192 = dma.done.wait [#allocation5], 256  }
   0xa   :  { %193 = vsyncadd [#allocation5], 4294967040  ;;  %v60_v0 = vld [vmem:[#allocation2] sm:$0xff]  ;;  %v61_v1 = vld [vmem:[#allocation2 + $0x8] sm:$0xff]  ;;  %vm57_vm0 = vcmask 7168   ;;  %v196_v8 = vmov 0.0  }
   0xb   :  { %v129_v2 = vmul.f32 -1.442695, %v60_v0  ;;  %v130_v3 = vmul.f32 -1.442695, %v61_v1  ;;  %58 = vst.msk [vmem:[%s247_s2] sm:$0xff] %vm57_vm0, %v196_v8  ;;  %v62_v24 = vld [vmem:[#allocation4] sm:$0xff] }
   0xc   :  { %59 = vst.msk [vmem:[%s248_s3] sm:$0xff] %vm57_vm0, %v196_v8  ;;  %v63_v26 = vld [vmem:[#allocation4 + $0x8] sm:$0xff] }
   0xd   :  { %134 = vpow2.f32 %v129_v2 }
   0xe   :  { %136 = vpow2.f32 %v130_v3 }
  0x12   :  { %v102_v37 = vld [vmem:[%s247_s2] sm:$0xff] }
  0x13   :  { %v135_v4 = vpop.eup %134  ;;  %v111_v40 = vld [vmem:[%s248_s3] sm:$0xff] }
  0x14   :  { %v137_v5 = vpop.eup %136  ;;  %v70_v6 = vadd.f32 1.0, %v135_v4 }
  0x15   :  { %v71_v7 = vadd.f32 1.0, %v137_v5 }
  0x16   :  { %138 = vrcp.f32 %v70_v6  ;;  %vm77_vm1 = vweird.f32 %v70_v6  ;;  %v83_v12 = vand.u32 2147483648, %v70_v6  ;;  %v81_v15 = vand.u32 2147483647, %v70_v6 }
  0x17   :  { %140 = vrcp.f32 %v71_v7  ;;  %v98_v16 = vand.u32 2147483648, %v71_v7  ;;  %vm92_vm3 = vweird.f32 %v71_v7  ;;  %v96_v18 = vand.u32 2147483647, %v71_v7 }
  0x18   :  { %v84_v20 = vor.u32 1.1754944e-38, %v83_v12  ;;  %vm82_vm6 = vcmp.eq.f32.partialorder %v81_v15, 8.507059e+37 }
  0x19   :  { %v99_v23 = vor.u32 1.1754944e-38, %v98_v16  ;;  %vm97_vm8 = vcmp.eq.f32.partialorder %v96_v18, 8.507059e+37 }
  0x1c   :  { %v139_v9 = vpop.eup %138 }
  0x1d   :  { %v141_v10 = vpop.eup %140  ;;  %v73_v11 = vmul.f32 %v139_v9, %v70_v6  ;;  %vm78_vm2 = vweird.f32 %v139_v9 }
  0x1e   :  { %v88_v13 = vmul.f32 %v141_v10, %v71_v7  ;;  %vm93_vm4 = vweird.f32 %v141_v10  ;;  %vm79_vm5 = vmor %vm77_vm1, %vm78_vm2 }
  0x1f   :  { %v74_v14 = vsub.f32 1.0, %v73_v11  ;;  %vm94_vm7 = vmor %vm92_vm3, %vm93_vm4 }
  0x20   :  { %v89_v17 = vsub.f32 1.0, %v88_v13 }
  0x21   :  { %v75_v19 = vmul.f32 %v139_v9, %v74_v14 }
  0x22   :  { %v90_v21 = vmul.f32 %v141_v10, %v89_v17 }
  0x23   :  { %v76_v22 = vadd.f32 %v139_v9, %v75_v19 }
  0x24   :  { %v91_v25 = vadd.f32 %v141_v10, %v90_v21 }
  0x25   :  { %v80_v27 = vsel %vm79_vm5, %v139_v9, %v76_v22 }
  0x26   :  { %v85_v28 = vsel %vm82_vm6, %v84_v20, %v80_v27  ;;  %v95_v29 = vsel %vm94_vm7, %v141_v10, %v91_v25 }
  0x27   :  { %v100_v30 = vsel %vm97_vm8, %v99_v23, %v95_v29  ;;  %v103_v31 = vmul.f32 %v85_v28, %v62_v24  ;;  %v112_v34 = vadd.f32 %v85_v28, %v62_v24 }
  0x28   :  { %v104_v32 = vmul.f32 %v100_v30, %v63_v26  ;;  %v113_v35 = vadd.f32 %v100_v30, %v63_v26 }
  0x2a   :  { %v105_v33 = vadd.f32 %v104_v32, %v103_v31  ;;  %v114_v36 = vadd.f32 %v113_v35, %v112_v34 }
  0x2c   :  { %106 = vadd.xlane.f32.xlu0 %v105_v33 }
  0x34   :  { %115 = vadd.xlane.f32.xlu0 %v114_v36 }
  0x9f   :  { %v107_v38 = vpop.xlane.xlu0 %106 }
  0xa0   :  { %v108_v39 = vadd.f32 %v107_v38, %v102_v37 }
  0xa2   :  { %110 = vst.msk [vmem:[%s247_s2] sm:$0xff] %vm57_vm0, %v108_v39 }
  0xa7   :  { %v116_v41 = vpop.xlane.xlu0 %115 }
  0xa8   :  { %v117_v42 = vadd.f32 %v116_v41, %v111_v40 }
  0xaa   :  { %118 = vst.msk [vmem:[%s248_s3] sm:$0xff] %vm57_vm0, %v117_v42 }
  0xab   :  { %127 = vsyncpa [#allocation3], 1 }
  0xac   :  { %128 = vsyncpa [#allocation5], 1 }

</bundles_post_ra>
